<compile_context>
chip_gen: v7x
topology: tpu7x:2x2x1
jax: 0.10.0
libtpu: 0.0.40
codegen_flags: <defaults>
</compile_context>

<pallas_src>
import jax
import jax.numpy as jnp
from jax import lax
from jax.experimental import pallas as pl
from jax.experimental.pallas import tpu as pltpu

KH = KW = 4
STRIDE = 2
PAD = 1
BN_EPS = 1e-5
LEAKY_SLOPE = 0.2
LANE = 128


def _round_up(x, m):
    return (x + m - 1) // m * m


def _vmem_limits():
    """Generation-aware VMEM limit/budget (v5e/v6e: 128 MiB, v7x: 64 MiB/TC)."""
    cap = 128 * 1024 * 1024
    try:
        cap = int(pltpu.get_tpu_info().vmem_capacity_bytes)
    except Exception:
        pass  # fall back to a conservative assumption
    limit = max(min(int(cap * 0.75), cap - 24 * 1024 * 1024), 32 * 1024 * 1024)
    budget = limit - 8 * 1024 * 1024  # headroom for compiler scratch
    return limit, budget


# ---------------------------------------------------------------------------
# Pass 1: tiled matmul (bf16 operands on the MXU, f32 accumulation) plus
# per-tile BatchNorm partial sums; conv intermediate stored in bf16.
# ---------------------------------------------------------------------------
def _matmul_stats_kernel(p_ref, w_ref, y_ref, psum_ref, pssq_ref):
    # p: (TM, Kp) bf16   w: (Kp, Cp) bf16 (VMEM-resident, single-buffered)
    # y: (TM, Cp) bf16   psum/pssq: (1, 8, Cp) f32
    acc = jnp.dot(p_ref[...], w_ref[...], preferred_element_type=jnp.float32)
    # BN partials from the full-precision accumulator (before the bf16 cast).
    s = jnp.sum(acc, axis=0, keepdims=True)        # (1, Cp)
    ss = jnp.sum(acc * acc, axis=0, keepdims=True)  # (1, Cp)
    # Partial-stat outputs are (1, 8, Cp) sublane-aligned blocks; replicate the
    # row across the 8 sublanes, the epilogue reads row 0.
    psum_ref[...] = jnp.broadcast_to(s, psum_ref.shape)
    pssq_ref[...] = jnp.broadcast_to(ss, pssq_ref.shape)
    y_ref[...] = acc.astype(jnp.bfloat16)


# ---------------------------------------------------------------------------
# Pass 2: fused BatchNorm affine (precomputed scale/shift) + LeakyReLU(0.2).
# Reads the bf16 conv intermediate, computes in f32, writes f32 output.
# ---------------------------------------------------------------------------
def _bn_lrelu_kernel(y_ref, scale_ref, shift_ref, o_ref):
    z = y_ref[...].astype(jnp.float32) * scale_ref[...] + shift_ref[...]
    o_ref[...] = jnp.where(z >= 0, z, LEAKY_SLOPE * z)


def _im2col_bf16(x_nchw):
    """NCHW -> (M, K) bf16 patch matrix, K laid out as (kh, kw, cin)."""
    n, c_in, h, w = x_nchw.shape
    h_out = (h + 2 * PAD - KH) // STRIDE + 1
    w_out = (w + 2 * PAD - KW) // STRIDE + 1
    x_nhwc = jnp.transpose(x_nchw.astype(jnp.bfloat16), (0, 2, 3, 1))
    x_pad = jnp.pad(x_nhwc, ((0, 0), (PAD, PAD), (PAD, PAD), (0, 0)))
    cols = []
    for kh in range(KH):
        for kw in range(KW):
            cols.append(x_pad[:, kh:kh + STRIDE * h_out:STRIDE,
                              kw:kw + STRIDE * w_out:STRIDE, :])
    patches = jnp.concatenate(cols, axis=-1)        # (N, Ho, Wo, KH*KW*Cin)
    return patches.reshape(n * h_out * w_out, KH * KW * c_in), (n, h_out, w_out)


def _choose_tm(m, k_pad, c_pad, budget_bytes):
    """Largest pass-1 M-tile (multiple of 16) whose working set fits VMEM."""
    # Single-buffered weights + double-buffered stats blocks.
    resident = k_pad * c_pad * 2 + 4 * 8 * c_pad * 4
    tm = 2048
    while tm > 16:
        # patch in (bf16, x2) + y out (bf16, x2) + in-kernel f32 accumulator
        need = resident + 2 * tm * (k_pad * 2 + c_pad * 2) + tm * c_pad * 4
        if need <= budget_bytes:
            break
        tm //= 2
    tm = max(min(tm, _round_up(m, 16)), 16)
    # Megacore (v7x): make sure there are >= 2 parallel grid steps when M is
    # big enough for the split to be worthwhile.
    if m >= 128 and _round_up(m, tm) == tm:
        tm = max(16, _round_up(_round_up(m, 16) // 2, 16))
    return tm


def _choose_tm2(m_pad, tm, c_pad, budget_bytes):
    """Pass-2 streaming tile: grow independently of the matmul tile."""
    tm2 = tm
    while (tm2 * 2 <= 8192
           and m_pad % (tm2 * 2) == 0
           and 12 * (tm2 * 2) * c_pad + 16 * c_pad <= budget_bytes
           and m_pad // (tm2 * 2) >= 2):
        tm2 *= 2
    return tm2


def unet_encoder_forward(x_nchw, w_oihw, bias, gamma, beta):
    """Forward pass of UNetEncoder(norm=True, drop_rate=0.0).

    `bias` is accepted for interface parity with the PyTorch module but not
    used: with training-mode BatchNorm the conv bias is exactly cancelled by
    the batch-mean subtraction.
    """
    del bias
    c_out = w_oihw.shape[0]
    vmem_limit, vmem_budget = _vmem_limits()

    patches, (n, h_out, w_out) = _im2col_bf16(x_nchw)
    m, k = patches.shape

    k_pad = _round_up(k, LANE)
    c_pad = _round_up(c_out, LANE)
    tm = _choose_tm(m, k_pad, c_pad, vmem_budget)
    m_pad = _round_up(m, tm)
    grid_m = m_pad // tm

    # Single zero-pad of the bf16 patch matrix (padded rows/cols contribute
    # exactly zero to the batch statistics because the conv bias is dropped).
    p_bf = jnp.pad(patches, ((0, m_pad - m), (0, k_pad - k)))
    # (Cout, Cin, KH, KW) -> (KH*KW*Cin, Cout) matching the patch layout.
    w_flat = jnp.transpose(w_oihw, (2, 3, 1, 0)).reshape(k, c_out)
    w_bf = jnp.pad(w_flat.astype(jnp.bfloat16),
                   ((0, k_pad - k), (0, c_pad - c_out)))

    flops1 = 2 * m_pad * k_pad * c_pad
    bytes1 = (m_pad * k_pad * 2 + k_pad * c_pad * 2
              + m_pad * c_pad * 2 + 2 * grid_m * 8 * c_pad * 4)

    y, psum, pssq = pl.pallas_call(
        _matmul_stats_kernel,
        out_shape=(
            jax.ShapeDtypeStruct((m_pad, c_pad), jnp.bfloat16),
            jax.ShapeDtypeStruct((grid_m, 8, c_pad), jnp.float32),
            jax.ShapeDtypeStruct((grid_m, 8, c_pad), jnp.float32),
        ),
        grid=(grid_m,),
        in_specs=[
            pl.BlockSpec((tm, k_pad), lambda i: (i, 0)),       # patch tile
            pl.BlockSpec((k_pad, c_pad), lambda i: (0, 0),     # resident weights
                         pipeline_mode=pl.Buffered(buffer_count=1)),
        ],
        out_specs=(
            pl.BlockSpec((tm, c_pad), lambda i: (i, 0)),       # bf16 conv tile
            pl.BlockSpec((1, 8, c_pad), lambda i: (i, 0, 0)),
            pl.BlockSpec((1, 8, c_pad), lambda i: (i, 0, 0)),
        ),
        compiler_params=pltpu.CompilerParams(
            dimension_semantics=("parallel",),
            vmem_limit_bytes=vmem_limit),
        cost_estimate=pl.CostEstimate(
            flops=flops1, transcendentals=0, bytes_accessed=bytes1),
    )(p_bf, w_bf)

    # Tiny JAX epilogue: fold per-tile partials into per-channel scale/shift.
    # Padded rows/channels are exactly zero, so dividing by the real M keeps
    # the statistics identical to PyTorch's batch statistics.
    # TODO(synk): E[y^2]-E[y]^2 can cancel for very large M; switch to
    #   per-tile mean-centered partials if that regime matters.
    total_sum = jnp.sum(psum[:, 0, :], axis=0)
    total_ssq = jnp.sum(pssq[:, 0, :], axis=0)
    inv_m = 1.0 / m
    mean = total_sum * inv_m
    var = jnp.maximum(total_ssq * inv_m - mean * mean, 0.0)
    gamma_p = jnp.zeros((c_pad,), jnp.float32).at[:c_out].set(gamma)
    beta_p = jnp.zeros((c_pad,), jnp.float32).at[:c_out].set(beta)
    scale_row = gamma_p * lax.rsqrt(var + BN_EPS)
    shift_row = beta_p - mean * scale_row
    scale = scale_row.reshape(1, c_pad)
    shift = shift_row.reshape(1, c_pad)

    # Pass 2 is a pure streaming op: use its own (larger) tile size.
    tm2 = _choose_tm2(m_pad, tm, c_pad, vmem_budget)
    grid_m2 = m_pad // tm2
    # NOTE: input_output_aliases would halve the intermediate's HBM footprint,
    # but y is bf16 and the final activation is f32, so no aliasing here.
    out_flat = pl.pallas_call(
        _bn_lrelu_kernel,
        out_shape=jax.ShapeDtypeStruct((m_pad, c_pad), jnp.float32),
        grid=(grid_m2,),
        in_specs=[
            pl.BlockSpec((tm2, c_pad), lambda i: (i, 0)),
            pl.BlockSpec((1, c_pad), lambda i: (0, 0)),
            pl.BlockSpec((1, c_pad), lambda i: (0, 0)),
        ],
        out_specs=pl.BlockSpec((tm2, c_pad), lambda i: (i, 0)),
        compiler_params=pltpu.CompilerParams(
            dimension_semantics=("parallel",),
            vmem_limit_bytes=vmem_limit),
        cost_estimate=pl.CostEstimate(
            flops=3 * m_pad * c_pad, transcendentals=0,
            bytes_accessed=m_pad * c_pad * (2 + 4) + 2 * c_pad * 4),
    )(y, scale, shift)

    out_nhwc = out_flat[:m, :c_out].reshape(n, h_out, w_out, c_out)
    return jnp.transpose(out_nhwc, (0, 3, 1, 2))  # back to NCHW


def _reference_forward(x_nchw, w_oihw, bias, gamma, beta, *, match_kernel=False):
    """Pure-JAX reference (conv + batch-stat BN + LeakyReLU).

    match_kernel=True mirrors the kernel's precision choices: bf16-rounded
    MXU operands, f32 batch statistics taken *before* the bf16 rounding of
    the conv intermediate, affine applied to the bf16-rounded intermediate.
    """
    if match_kernel:
        x_nchw = x_nchw.astype(jnp.bfloat16).astype(jnp.float32)
        w_oihw = w_oihw.astype(jnp.bfloat16).astype(jnp.float32)
    y = lax.conv_general_dilated(
        x_nchw, w_oihw, window_strides=(STRIDE, STRIDE),
        padding=[(PAD, PAD), (PAD, PAD)],
        dimension_numbers=("NCHW", "OIHW", "NCHW"),
        precision=lax.Precision.HIGHEST)
    if not match_kernel:
        y = y + bias.reshape(1, -1, 1, 1)  # cancelled by BN anyway
    mean = jnp.mean(y, axis=(0, 2, 3), keepdims=True)
    var = jnp.mean((y - mean) ** 2, axis=(0, 2, 3), keepdims=True)
    scale = gamma.reshape(1, -1, 1, 1) * lax.rsqrt(var + BN_EPS)
    shift = beta.reshape(1, -1, 1, 1) - mean * scale
    if match_kernel:
        y = y.astype(jnp.bfloat16).astype(jnp.float32)  # bf16 intermediate
    z = y * scale + shift
    return jnp.where(z >= 0, z, LEAKY_SLOPE * z)


if __name__ == "__main__":
    # Small shapes consistent with the module: N=2, C_in=4, C_out=8, 16x16.
    N, C_IN, C_OUT, H, W = 2, 4, 8, 16, 16

    key = jax.random.PRNGKey(0)
    kx, kw, kb, kg, kbt = jax.random.split(key, 5)

    x = jax.random.normal(kx, (N, C_IN, H, W), dtype=jnp.float32)

    fan_in = C_IN * KH * KW
    bound = 1.0 / float(jnp.sqrt(jnp.float32(fan_in)))
    w_conv = jax.random.uniform(kw, (C_OUT, C_IN, KH, KW), jnp.float32,
                                -bound, bound)
    b_conv = jax.random.uniform(kb, (C_OUT,), jnp.float32, -bound, bound)
    gamma = 1.0 + 0.1 * jax.random.normal(kg, (C_OUT,), dtype=jnp.float32)
    beta = 0.1 * jax.random.normal(kbt, (C_OUT,), dtype=jnp.float32)

    out = jax.jit(unet_encoder_forward)(x, w_conv, b_conv, gamma, beta)
    out = jax.block_until_ready(out)
    assert out.shape == (N, C_OUT, H // 2, W // 2), out.shape

    # Matched-precision reference (bf16 MXU operands, bf16 conv intermediate,
    # f32 statistics): should agree to accumulation noise, with a tolerance
    # that also covers rare bf16 rounding-boundary flips.
    ref_match = _reference_forward(x, w_conv, b_conv, gamma, beta,
                                   match_kernel=True)
    max_err = float(jnp.max(jnp.abs(out - ref_match)))
    mean_err = float(jnp.mean(jnp.abs(out - ref_match)))
    assert max_err < 2e-2, ("max err vs matched reference", max_err)
    assert mean_err < 1e-3, ("mean err vs matched reference", mean_err)

    # Full-f32 reference: differs only by the intentional bf16 rounding of the
    # MXU operands and conv intermediate; sanity-check the deviation is small.
    ref_f32 = _reference_forward(x, w_conv, b_conv, gamma, beta)
    err_f32 = float(jnp.max(jnp.abs(out - ref_f32)))
    assert err_f32 < 0.1, err_f32

    print("KERNEL_OK")
</pallas_src>

<mosaic_0001>
module attributes {stable_mosaic.version = 11 : i64} {
  func.func @_matmul_stats_kernel(%arg0: i32, %arg1: memref<64x128xbf16, #tpu.memory_space<vmem>>, %arg2: memref<128x128xbf16, #tpu.memory_space<vmem>>, %arg3: memref<64x128xbf16, #tpu.memory_space<vmem>>, %arg4: memref<1x8x128xf32, #tpu.memory_space<vmem>>, %arg5: memref<1x8x128xf32, #tpu.memory_space<vmem>>) attributes {dimension_semantics = [#tpu.dimension_semantics<parallel>], iteration_bounds = array<i64: 2>, scalar_prefetch = 0 : i64, scratch_operands = 0 : i64, tpu.core_type = #tpu.core_type<tc>, window_params = [{transform_indices = @transform_0, window_bounds = array<i64: 64, 128>}, {pipeline_mode = #tpu.pipeline_mode<synchronous>, transform_indices = @transform_1, window_bounds = array<i64: 128, 128>}, {transform_indices = @transform_2, window_bounds = array<i64: 64, 128>}, {transform_indices = @transform_3, window_bounds = array<i64: 1, 8, 128>}, {transform_indices = @transform_4, window_bounds = array<i64: 1, 8, 128>}]} {
    %c0 = arith.constant 0 : index
    %c0_0 = arith.constant 0 : index
    %0 = vector.load %arg1[%c0, %c0_0] : memref<64x128xbf16, #tpu.memory_space<vmem>>, vector<64x128xbf16>
    %c0_1 = arith.constant 0 : index
    %c0_2 = arith.constant 0 : index
    %1 = vector.load %arg2[%c0_1, %c0_2] : memref<128x128xbf16, #tpu.memory_space<vmem>>, vector<128x128xbf16>
    %cst = arith.constant dense<0.000000e+00> : vector<64x128xf32>
    %2 = tpu.matmul %0, %1, %cst {dimension_numbers = #tpu.dot_dimension_numbers<[1], [0], [0], [1], [0, 0, 1, 1], [], []>} : vector<64x128xbf16>, vector<128x128xbf16>, vector<64x128xf32> -> vector<64x128xf32>
    %cst_3 = arith.constant dense<0.000000e+00> : vector<128xf32>
    %3 = vector.multi_reduction <add>, %2, %cst_3 [0] : vector<64x128xf32> to vector<128xf32>
    %4 = vector.shape_cast %3 : vector<128xf32> to vector<1x128xf32>
    %5 = arith.mulf %2, %2 : vector<64x128xf32>
    %cst_4 = arith.constant dense<0.000000e+00> : vector<128xf32>
    %6 = vector.multi_reduction <add>, %5, %cst_4 [0] : vector<64x128xf32> to vector<128xf32>
    %7 = vector.shape_cast %6 : vector<128xf32> to vector<1x128xf32>
    %8 = vector.shape_cast %4 : vector<1x128xf32> to vector<1x1x128xf32>
    %9 = vector.broadcast %8 : vector<1x1x128xf32> to vector<1x8x128xf32>
    %c0_5 = arith.constant 0 : index
    %c0_6 = arith.constant 0 : index
    %c0_7 = arith.constant 0 : index
    %10 = vector.load %arg4[%c0_5, %c0_6, %c0_7] : memref<1x8x128xf32, #tpu.memory_space<vmem>>, vector<1x8x128xf32>
    tpu.vector_store %arg4[%c0_5, %c0_6, %c0_7], %9 {strides = array<i32>} : memref<1x8x128xf32, #tpu.memory_space<vmem>>, vector<1x8x128xf32>,
    %11 = vector.shape_cast %7 : vector<1x128xf32> to vector<1x1x128xf32>
    %12 = vector.broadcast %11 : vector<1x1x128xf32> to vector<1x8x128xf32>
    %c0_8 = arith.constant 0 : index
    %c0_9 = arith.constant 0 : index
    %c0_10 = arith.constant 0 : index
    %13 = vector.load %arg5[%c0_8, %c0_9, %c0_10] : memref<1x8x128xf32, #tpu.memory_space<vmem>>, vector<1x8x128xf32>
    tpu.vector_store %arg5[%c0_8, %c0_9, %c0_10], %12 {strides = array<i32>} : memref<1x8x128xf32, #tpu.memory_space<vmem>>, vector<1x8x128xf32>,
    %14 = arith.truncf %2 : vector<64x128xf32> to vector<64x128xbf16>
    %c0_11 = arith.constant 0 : index
    %c0_12 = arith.constant 0 : index
    %15 = vector.load %arg3[%c0_11, %c0_12] : memref<64x128xbf16, #tpu.memory_space<vmem>>, vector<64x128xbf16>
    tpu.vector_store %arg3[%c0_11, %c0_12], %14 {strides = array<i32>} : memref<64x128xbf16, #tpu.memory_space<vmem>>, vector<64x128xbf16>,
    return
  }
  func.func @transform_0(%arg0: i32) -> (i32, i32) {
    %c0_i32 = arith.constant 0 : i32
    %c0_i32_0 = arith.constant 0 : i32
    return %arg0, %c0_i32 : i32, i32
  }
  func.func @transform_1(%arg0: i32) -> (i32, i32) {
    %c0_i32 = arith.constant 0 : i32
    %c0_i32_0 = arith.constant 0 : i32
    %c0_i32_1 = arith.constant 0 : i32
    return %c0_i32, %c0_i32_0 : i32, i32
  }
  func.func @transform_2(%arg0: i32) -> (i32, i32) {
    %c0_i32 = arith.constant 0 : i32
    %c0_i32_0 = arith.constant 0 : i32
    return %arg0, %c0_i32 : i32, i32
  }
  func.func @transform_3(%arg0: i32) -> (i32, i32, i32) {
    %c0_i32 = arith.constant 0 : i32
    %c0_i32_0 = arith.constant 0 : i32
    %c0_i32_1 = arith.constant 0 : i32
    return %arg0, %c0_i32, %c0_i32_0 : i32, i32, i32
  }
  func.func @transform_4(%arg0: i32) -> (i32, i32, i32) {
    %c0_i32 = arith.constant 0 : i32
    %c0_i32_0 = arith.constant 0 : i32
    %c0_i32_1 = arith.constant 0 : i32
    return %arg0, %c0_i32, %c0_i32_0 : i32, i32, i32
  }
}

module attributes {stable_mosaic.version = 11 : i64} {
  func.func @_bn_lrelu_kernel(%arg0: i32, %arg1: memref<64x128xbf16, #tpu.memory_space<vmem>>, %arg2: memref<1x128xf32, #tpu.memory_space<vmem>>, %arg3: memref<1x128xf32, #tpu.memory_space<vmem>>, %arg4: memref<64x128xf32, #tpu.memory_space<vmem>>) attributes {dimension_semantics = [#tpu.dimension_semantics<parallel>], iteration_bounds = array<i64: 2>, scalar_prefetch = 0 : i64, scratch_operands = 0 : i64, tpu.core_type = #tpu.core_type<tc>, window_params = [{transform_indices = @transform_0, window_bounds = array<i64: 64, 128>}, {pipeline_mode = #tpu.pipeline_mode<synchronous>, transform_indices = @transform_1, window_bounds = array<i64: 1, 128>}, {pipeline_mode = #tpu.pipeline_mode<synchronous>, transform_indices = @transform_2, window_bounds = array<i64: 1, 128>}, {transform_indices = @transform_3, window_bounds = array<i64: 64, 128>}]} {
    %c0 = arith.constant 0 : index
    %c0_0 = arith.constant 0 : index
    %0 = vector.load %arg1[%c0, %c0_0] : memref<64x128xbf16, #tpu.memory_space<vmem>>, vector<64x128xbf16>
    %1 = arith.extf %0 : vector<64x128xbf16> to vector<64x128xf32>
    %c0_1 = arith.constant 0 : index
    %c0_2 = arith.constant 0 : index
    %2 = vector.load %arg2[%c0_1, %c0_2] : memref<1x128xf32, #tpu.memory_space<vmem>>, vector<1x128xf32>
    %3 = vector.broadcast %2 : vector<1x128xf32> to vector<64x128xf32>
    %4 = arith.mulf %1, %3 : vector<64x128xf32>
    %c0_3 = arith.constant 0 : index
    %c0_4 = arith.constant 0 : index
    %5 = vector.load %arg3[%c0_3, %c0_4] : memref<1x128xf32, #tpu.memory_space<vmem>>, vector<1x128xf32>
    %6 = vector.broadcast %5 : vector<1x128xf32> to vector<64x128xf32>
    %7 = arith.addf %4, %6 : vector<64x128xf32>
    %cst = arith.constant 0.000000e+00 : f32
    %8 = vector.broadcast %cst : f32 to vector<64x128xf32>
    %9 = arith.cmpf oge, %7, %8 : vector<64x128xf32>
    %cst_5 = arith.constant 2.000000e-01 : f32
    %10 = vector.broadcast %cst_5 : f32 to vector<64x128xf32>
    %11 = arith.mulf %10, %7 : vector<64x128xf32>
    %12 = arith.select %9, %7, %11 : vector<64x128xi1>, vector<64x128xf32>
    %c0_6 = arith.constant 0 : index
    %c0_7 = arith.constant 0 : index
    %13 = vector.load %arg4[%c0_6, %c0_7] : memref<64x128xf32, #tpu.memory_space<vmem>>, vector<64x128xf32>
    tpu.vector_store %arg4[%c0_6, %c0_7], %12 {strides = array<i32>} : memref<64x128xf32, #tpu.memory_space<vmem>>, vector<64x128xf32>,
    return
  }
  func.func @transform_0(%arg0: i32) -> (i32, i32) {
    %c0_i32 = arith.constant 0 : i32
    %c0_i32_0 = arith.constant 0 : i32
    return %arg0, %c0_i32 : i32, i32
  }
  func.func @transform_1(%arg0: i32) -> (i32, i32) {
    %c0_i32 = arith.constant 0 : i32
    %c0_i32_0 = arith.constant 0 : i32
    %c0_i32_1 = arith.constant 0 : i32
    return %c0_i32, %c0_i32_0 : i32, i32
  }
  func.func @transform_2(%arg0: i32) -> (i32, i32) {
    %c0_i32 = arith.constant 0 : i32
    %c0_i32_0 = arith.constant 0 : i32
    %c0_i32_1 = arith.constant 0 : i32
    return %c0_i32, %c0_i32_0 : i32, i32
  }
  func.func @transform_3(%arg0: i32) -> (i32, i32) {
    %c0_i32 = arith.constant 0 : i32
    %c0_i32_0 = arith.constant 0 : i32
    return %arg0, %c0_i32 : i32, i32
  }
}

</mosaic_0001>

<bundles_post_ra>
// kernel: unet_encoder_forward.3
= control target key start
LH: loop header
LB: loop body
LE: loop exit
PB: predicated region body
PF: predicated region fallthrough
CT: control target
= control target key end

     0   :  { %8 = vsyncpa [#allocation3], 0  ;;  %s931_s0 = inlined_call_operand.hbm [shape: bf16[128,128], index: 0, kind: input, shape index: {}]   ;;  %s932_s1 = inlined_call_operand.hbm [shape: f32[1,128], index: 1, kind: input, shape index: {}]   ;;  %s933_s2 = inlined_call_operand.hbm [shape: f32[1,128], index: 2, kind: input, shape index: {}]   ;;  %s934_s3 = inlined_call_operand.hbm [shape: f32[128,128], index: 3, kind: output, shape index: {}]  }
   0x1   :  { %10 = vsyncpa [#allocation3 + $0x1], 0 }
   0x2   :  { %11 = vsyncpa [#allocation6], 0 }
   0x3   :  { %12 = vsyncpa [#allocation4], 0 }
   0x4   :  { %14 = vsyncpa [#allocation4 + $0x1], 0  ;;  %s698_s12 = smov 0   ;;  %s700_s13 = smov 0  }
   0x5   :  { %s702_s14 = smov 0   ;;  %s704_s15 = smov 0  }
   0x6 LB: > { %s719_s16 = sadd.s32 4294967295, %s668_s15   ;;  %s400_s17 = sadd.s32 4294967294, %s668_s15   ;;  %s668_s15 = sphi %s704_s15, %s959_s15   ;;  %s664_s14 = sphi %s702_s14, %s958_s14   ;;  %s660_s13 = sphi %s700_s13, %s957_s13   ;;  %s656_s12 = sphi %s698_s12, %s956_s12  }
   0x7   : > { %s723_s18 = sadd.s32 1, %s668_s15   ;;  %s27_s19 = sadd.s32 1, %s664_s14 }
   0x8   : > { %s24_s20 = ssub.s32 %s668_s15, %s723_s18  ;;  %p34_p0 = scmp.ne.s32.totalorder %s664_s14, %s660_s13 }
   0x9   : > { %p25_p1 = scmp.eq.s32.totalorder %s24_s20, 0  ;;  %p35_p2 = scmp.eq.s32.totalorder %s668_s15, 0 }
   0xa   : > { %p40_p3 = scmp.ne.s32.totalorder %s660_s13, %s656_s12  ;;  %p935_p4 = scmp.eq.s32.totalorder %s719_s16, 0 }
   0xb   : > { %s735_s21 = scalar_select %p25_p1, %s664_s14, %s27_s19  }
   0xc   : > { %p737_p5 = por %p35_p2, %p34_p0  ;;  %p743_p6 = por %p935_p4, %p40_p3 }
   0xd   : > { %p106_p7 = scmp.eq.s32.totalorder %s719_s16, 1  ;;  %p112_p8 = scmp.eq.s32.totalorder %s400_s17, 1 }
   0xe   : > { %s941_s23 = scalar_select %p743_p6, 1, 0 }
   0xf   : > { %p401_p9 = scmp.ge.s32.totalorder %s668_s15, 1  ;;  %p119_p10 = scmp.lt.s32.totalorder %s668_s15, 3 }
  0x10   : > { %p750_p11 = por %p106_p7, %p34_p0  ;;  %p754_p12 = por %p112_p8, %p40_p3 }
  0x11   : > { %p758_p13 = pnand %p401_p9, %p119_p10  ;;  %s670_s27 = smov [#allocation5]  }
  0x12   : > { %s942_s24 = scalar_select %p750_p11, 1, 0 }
  0x13   : > { %s943_s25 = scalar_select %p754_p12, 1, 0 }
  0x14   : > { %s944_s26 = scalar_select %p758_p13, 1, 0 }
  0x15   : > { %p453_p2 = pneg %p758_p13  ;;  %s132_s28 = sshll.u32 %s670_s27, 4  ;;  %s133_s28 = int_to_ptr.vmem [resolvable:$true] %s132_s28 }
  0x16   : > { %p470_p4 = scmp.lt.s32.totalorder %s668_s15, 2  ;;  %p945_p0 = scmp.eq.s32.totalorder %s719_s16, 0 }
  0x17   : > { %s671_s4 = smov [#allocation7]   ;;  %s512_s8 = scalar_lea.hbm %s932_s1, 16 }
  0x18   : > { %p768_p7 = pnand %p453_p2, %p945_p0  ;;  %p774_p3 = pnand %p470_p4, %p737_p5 }
  0x19   : > { %s143_s5 = sshll.u32 %s671_s4, 4  ;;  %p513_p8 = scmp.ne.s32.totalorder %s932_s1, %s512_s8  ;;  %s778_s5 = int_to_ptr.vmem [resolvable:$true] %s143_s5 }
  0x1a   : > { %s947_s30 = scalar_select %p774_p3, 1, 0 }
  0x1b   : > { %p514_p9 = pneg %p768_p7  ;;  %p519_p10 = scmp.lt.u32.totalorder %s512_s8, %s932_s1 }
  0x1d   : > { %p515_p4 = pnand %p514_p9, %p513_p8 }
  0x1f   : > { %p516_p5 = pneg %p515_p4 }
  0x21   : > { %p521_p2 = pnand %p519_p10, %p516_p5 }
  0x23   : > { %524 = shalt.err (!%p521_p2)
}
  0x24   : > { %s525_s19 = scalar_lea.vmem %s133_s28, 16  ;;  %s532_s20 = scalar_lea.vmem %s133_s28, 32 }
  0x25   : > { %p526_p0 = scmp.ne.s32.totalorder %s133_s28, %s525_s19  ;;  %p533_p11 = scmp.lt.s32.totalorder %s133_s28, %s133_s28 }
  0x26   : > { %p534_p6 = scmp.lt.s32.totalorder %s532_s20, %s525_s19 }
  0x27   : > { %p528_p1 = pnand %p526_p0, %p514_p9 }
  0x28   : > { %p535_p13 = por %p534_p6, %p533_p11 }
  0x29   : > { %p529_p12 = pneg %p528_p1 }
  0x2b   : > { %p536_p3 = pnand %p535_p13, %p529_p12 }
  0x2d   : > { %539 = shalt.err (!%p536_p3)
}
  0x2e   : > { %456 = dma.hbm_to_vmem [thread:$0]  (!%p768_p7), %s932_s1, 16, %s133_s28, [#allocation6]  }
  0x2f   : > { %s154_s4 = sand.u32 1, %s664_s14   ;;  %s540_s8 = scalar_lea.hbm %s933_s2, 16 }
  0x30   : > { %p541_p1 = scmp.ne.s32.totalorder %s933_s2, %s540_s8  ;;  %p547_p12 = scmp.lt.u32.totalorder %s540_s8, %s933_s2 }
  0x32   : > { %p543_p6 = pnand %p541_p1, %p514_p9 }
  0x34   : > { %p544_p11 = pneg %p543_p6 }
  0x36   : > { %p549_p13 = pnand %p547_p12, %p544_p11 }
  0x38   : > { %552 = shalt.err (!%p549_p13)
}
  0x39   : > { %s553_s28 = scalar_lea.vmem %s778_s5, 16  ;;  %s560_s19 = scalar_lea.vmem %s778_s5, 32 }
  0x3a   : > { %p554_p3 = scmp.ne.s32.totalorder %s778_s5, %s553_s28  ;;  %p561_p5 = scmp.lt.s32.totalorder %s778_s5, %s778_s5 }
  0x3b   : > { %p562_p10 = scmp.lt.s32.totalorder %s560_s19, %s553_s28 }
  0x3c   : > { %p556_p8 = pnand %p554_p3, %p514_p9 }
  0x3d   : > { %p563_p2 = por %p562_p10, %p561_p5 }
  0x3e   : > { %p557_p4 = pneg %p556_p8 }
  0x40   : > { %p564_p0 = pnand %p563_p2, %p557_p4 }
  0x42   : > { %567 = shalt.err (!%p564_p0)
}
  0x43   : > { %459 = dma.hbm_to_vmem [thread:$0]  (!%p768_p7), %s933_s2, 16, %s778_s5, [#allocation6]  }
  0x44   : > { %s405_s27 = sshll.u32 %s154_s4, 5  ;;  %s420_s6 = sshll.u32 %s668_s15, 9 }
  0x45   : > { %s833_s9 = scalar_lea.hbm %s931_s0, %s420_s6  ;;  %s158_s29 = scalar_lea.vmem [#allocation2], %s405_s27 }
  0x46   : > { %s165_s10 = sshll.u32 %s158_s29, 4  ;;  %s837_s11 = scalar_lea.sflag [#allocation3], %s154_s4  ;;  %s835_s10 = int_to_ptr.vmem [resolvable:$true] %s165_s10 }
  0x47   : > { %s568_s17 = scalar_lea.hbm %s833_s9, 512  ;;  %p948_p7 = scmp.ne.s32.totalorder %s947_s30, 0 }
  0x48   : > { %p569_p9 = scmp.ne.s32.totalorder %s833_s9, %s568_s17  ;;  %s573_s19 = scalar_lea.hbm %s931_s0, 1024 }
  0x49   : > { %p570_p1 = pneg %p948_p7  ;;  %p574_p12 = scmp.lt.u32.totalorder %s833_s9, %s931_s0 }
  0x4a   : > { %p575_p13 = scmp.lt.u32.totalorder %s573_s19, %s568_s17  ;;  %p577_p8 = scmp.lt.u32.totalorder %s568_s17, %s833_s9 }
  0x4b   : > { %p571_p6 = pnand %p570_p1, %p569_p9 }
  0x4c   : > { %p576_p3 = por %p575_p13, %p574_p12 }
  0x4d   : > { %p572_p11 = pneg %p571_p6 }
  0x4e   : > { %p578_p4 = por %p577_p8, %p576_p3 }
  0x50   : > { %p579_p5 = pnand %p578_p4, %p572_p11 }
  0x52   : > { %582 = shalt.err (!%p579_p5)
}
  0x53   : > { %s583_s4 = scalar_lea.vmem %s835_s10, 512  ;;  %s672_s27 = smov [#allocation2]  }
  0x54   : > { %p584_p10 = scmp.ne.s32.totalorder %s835_s10, %s583_s4  ;;  %s588_s6 = sshll.u32 %s672_s27, 4  ;;  %s589_s6 = int_to_ptr.vmem [resolvable:$false] %s588_s6 }
  0x55   : > { %s590_s7 = scalar_lea.vmem %s589_s6, 1024  ;;  %p591_p9 = scmp.lt.s32.totalorder %s835_s10, %s589_s6 }
  0x56   : > { %p586_p2 = pnand %p584_p10, %p570_p1  ;;  %p592_p6 = scmp.lt.s32.totalorder %s590_s7, %s583_s4 }
  0x58   : > { %p587_p0 = pneg %p586_p2  ;;  %p593_p12 = por %p592_p6, %p591_p9 }
  0x5a   : > { %p594_p13 = pnand %p593_p12, %p587_p0 }
  0x5c   : > { %597 = shalt.err (!%p594_p13)
}
  0x5d   : > { %s673_s8 = smov 64   ;;  %s674_s29 = smov 4  }
  0x5e   : > { %463 = dma.hbm_to_vmem [thread:$0]  (!%p948_p7), %s833_s9, 512, %s835_s10, %s837_s11, %s673_s8, %s673_s8, %s674_s29  }
  0x5f   : > { %p949_p1 = scmp.ne.s32.totalorder %s944_s26, 0 }
  0x60   : > { %s868_s17 = sand.u32 (!%p949_p1), 1, %s660_s13   ;;  %p950_p11 = scmp.ne.s32.totalorder (!%p949_p1), %s941_s23, 0 }
  0x61   : > { %177 = sbr.rel (%p949_p1) target bundleno = 138 (0x8a), region = 32  ;;  %s409_s5 = sshll.u32 (!%p949_p1), %s868_s17, 5 }
  0x62   : > { %s180_s28 = scalar_lea.sflag (!%p949_p1), [#allocation3], %s868_s17  ;;  %s183_s19 = scalar_lea.vmem (!%p949_p1), [#allocation2], %s409_s5 }
  0x68   : > { %643 = dma.done.wait (%p950_p11), %s180_s28, 512  }
  0x69   : > { %645 = vsyncadd (%p950_p11), %s180_s28, 4294966784  ;;  %p951_p3 = scmp.eq.s32.totalorder %s719_s16, 0 }
  0x6b   : > { %647 = dma.done.wait (%p951_p3), [#allocation6], 32   ;;  %p952_p7 = pmov %p951_p3 }
  0x6c   : > { %v423_v0 = vld [vmem:[%s183_s19] sm:$0xff]   ;;  %v438_v4 = vld [vmem:[%s183_s19 + $0x8] sm:$0xff]   ;;  %v439_v5 = vld [vmem:[%s183_s19 + $0x10] sm:$0xff]   ;;  %s412_s23 = sshll.u32 %s868_s17, 6  ;;  %s421_s9 = sshll.u32 %s719_s16, 10 }
  0x6d   : > { %649 = vsyncadd (%p952_p7), [#allocation6], 4294967264  ;;  %v413_v1 = vld [vmem:[#allocation5] ss:$0 sm:$0xff]  ;;  %v424_v2 = vunpack.c.l.bf16 %v423_v0  ;;  %v425_v3 = vunpack.c.h.bf16 %v423_v0  ;;  %v440_v6 = vld [vmem:[%s183_s19 + $0x18] sm:$0xff]   ;;  %v428_v8 = vunpack.c.l.bf16 %v438_v4  ;;  %v429_v9 = vunpack.c.h.bf16 %v438_v4  ;;  %s213_s26 = scalar_lea.vmem [#allocation8], %s412_s23  ;;  %s887_s11 = scalar_lea.hbm %s934_s3, %s421_s9 }
  0x6e   : > { %v414_v7 = vld [vmem:[#allocation7] ss:$0 sm:$0xff]  ;;  %v432_v10 = vunpack.c.l.bf16 %v439_v5  ;;  %v433_v11 = vunpack.c.h.bf16 %v439_v5  ;;  %v436_v14 = vunpack.c.l.bf16 %v440_v6  ;;  %v437_v15 = vunpack.c.h.bf16 %v440_v6  ;;  %s308_s30 = sshll.u32 %s213_s26, 4  ;;  %s295_s20 = scalar_lea.sflag [#allocation4], %s868_s17  ;;  %s882_s30 = int_to_ptr.vmem [resolvable:$true] %s308_s30 }
  0x6f   : > { %v239_v12 = vmul.f32 %v424_v2, %v413_v1  ;;  %v240_v13 = vmul.f32 %v425_v3, %v413_v1  ;;  %v241_v16 = vmul.f32 %v428_v8, %v413_v1  ;;  %v242_v17 = vmul.f32 %v429_v9, %v413_v1  ;;  %s598_s22 = scalar_lea.vmem %s882_s30, 1024  ;;  %p953_p4 = scmp.ne.s32.totalorder %s942_s24, 0 }
  0x70   : > { %v243_v18 = vmul.f32 %v432_v10, %v413_v1  ;;  %v244_v19 = vmul.f32 %v433_v11, %v413_v1  ;;  %v245_v22 = vmul.f32 %v436_v14, %v413_v1  ;;  %v246_v23 = vmul.f32 %v437_v15, %v413_v1  ;;  %p599_p8 = scmp.ne.s32.totalorder %s882_s30, %s598_s22  ;;  %s675_s4 = smov [#allocation8]  }
  0x71   : > { %v254_v20 = vadd.f32 %v414_v7, %v239_v12  ;;  %v255_v21 = vadd.f32 %v414_v7, %v240_v13  ;;  %v256_v24 = vadd.f32 %v414_v7, %v241_v16  ;;  %v257_v25 = vadd.f32 %v414_v7, %v242_v17  ;;  %s602_s27 = sshll.u32 %s675_s4, 4  ;;  %s603_s27 = int_to_ptr.vmem [resolvable:$false] %s602_s27 }
  0x72   : > { %v258_v26 = vadd.f32 %v414_v7, %v243_v18  ;;  %v259_v27 = vadd.f32 %v414_v7, %v244_v19  ;;  %v260_v39 = vadd.f32 %v414_v7, %v245_v22  ;;  %v261_v40 = vadd.f32 %v414_v7, %v246_v23  ;;  %p600_p5 = pnand %p599_p8, %p953_p4  ;;  %s604_s6 = scalar_lea.vmem %s603_s27, 2048 }
  0x73   : > { %vm262_vm0 = vcmp.ge.f32.partialorder %v254_v20, 0.0  ;;  %v270_v28 = vmul.f32 0.2, %v254_v20  ;;  %vm263_vm1 = vcmp.ge.f32.partialorder %v255_v21, 0.0  ;;  %v271_v29 = vmul.f32 0.2, %v255_v21  ;;  %p605_p2 = scmp.lt.s32.totalorder %s882_s30, %s603_s27  ;;  %p606_p0 = scmp.lt.s32.totalorder %s604_s6, %s598_s22 }
  0x74   : > { %vm264_vm2 = vcmp.ge.f32.partialorder %v256_v24, 0.0  ;;  %v272_v30 = vmul.f32 0.2, %v256_v24  ;;  %vm265_vm3 = vcmp.ge.f32.partialorder %v257_v25, 0.0  ;;  %v273_v31 = vmul.f32 0.2, %v257_v25  ;;  %p601_p10 = pneg %p600_p5 }
  0x75   : > { %v278_v32 = vsel %vm262_vm0, %v254_v20, %v270_v28  ;;  %v279_v33 = vsel %vm263_vm1, %v255_v21, %v271_v29  ;;  %vm266_vm4 = vcmp.ge.f32.partialorder %v258_v26, 0.0  ;;  %v274_v34 = vmul.f32 0.2, %v258_v26  ;;  %p607_p9 = por %p606_p0, %p605_p2 }
  0x76   : > { %286 = vst [vmem:[%s213_s26] sm:$0xff] %v278_v32  ;;  %287 = vst [vmem:[%s213_s26 + $0x8] sm:$0xff] %v279_v33  ;;  %v280_v35 = vsel %vm264_vm2, %v256_v24, %v272_v30  ;;  %v281_v36 = vsel %vm265_vm3, %v257_v25, %v273_v31  ;;  %vm267_vm5 = vcmp.ge.f32.partialorder %v259_v27, 0.0  ;;  %v275_v37 = vmul.f32 0.2, %v259_v27 }
  0x77   : > { %288 = vst [vmem:[%s213_s26 + $0x10] sm:$0xff] %v280_v35  ;;  %289 = vst [vmem:[%s213_s26 + $0x18] sm:$0xff] %v281_v36  ;;  %v282_v38 = vsel %vm266_vm4, %v258_v26, %v274_v34  ;;  %vm268_vm6 = vcmp.ge.f32.partialorder %v260_v39, 0.0  ;;  %v276_v42 = vmul.f32 0.2, %v260_v39  ;;  %vm269_vm7 = vcmp.ge.f32.partialorder %v261_v40, 0.0  ;;  %p608_p6 = pnand %p607_p9, %p601_p10 }
  0x78   : > { %290 = vst [vmem:[%s213_s26 + $0x20] sm:$0xff] %v282_v38  ;;  %v283_v41 = vsel %vm267_vm5, %v259_v27, %v275_v37  ;;  %v277_v43 = vmul.f32 0.2, %v261_v40 }
  0x79   : > { %291 = vst [vmem:[%s213_s26 + $0x28] sm:$0xff] %v283_v41  ;;  %v284_v44 = vsel %vm268_vm6, %v260_v39, %v276_v42 }
  0x7a   : > { %v285_v45 = vsel %vm269_vm7, %v261_v40, %v277_v43  ;;  %292 = vst [vmem:[%s213_s26 + $0x30] sm:$0xff] %v284_v44 }
  0x7b   : > { %293 = vst [vmem:[%s213_s26 + $0x38] sm:$0xff] %v285_v45 }
  0x7c   : > { %611 = shalt.err (!%p608_p6)
}
  0x7d   : > { %s612_s7 = scalar_lea.hbm %s887_s11, 1024  ;;  %s616_s5 = scalar_lea.hbm %s934_s3, 2048 }
  0x7e   : > { %p613_p12 = scmp.ne.s32.totalorder %s887_s11, %s612_s7  ;;  %p617_p11 = scmp.lt.u32.totalorder %s887_s11, %s934_s3 }
  0x7f   : > { %p618_p3 = scmp.lt.u32.totalorder %s616_s5, %s612_s7  ;;  %p620_p8 = scmp.lt.u32.totalorder %s612_s7, %s887_s11 }
  0x80   : > { %p614_p13 = pnand %p613_p12, %p953_p4 }
  0x81   : > { %p619_p7 = por %p618_p3, %p617_p11 }
  0x82   : > { %p615_p1 = pneg %p614_p13 }
  0x83   : > { %p621_p5 = por %p620_p8, %p619_p7 }
  0x85   : > { %p622_p10 = pnand %p621_p5, %p615_p1 }
  0x87   : > { %625 = shalt.err (!%p622_p10)
}
  0x88   : > { %s676_s23 = smov 128   ;;  %s677_s26 = smov 8  }
  0x89   : > { %451 = dma.vmem_to_hbm [thread:$0]  (%p953_p4), %s882_s30, 1024, %s887_s11, %s295_s20, %s676_s23, %s676_s23, %s677_s26  }
  0x8a PF: > { %s323_s9 = sand.u32 1, %s656_s12   ;;  %p954_p2 = scmp.ne.s32.totalorder %s943_s25, 0 }
  0x8b   : > { %p955_p0 = scmp.ge.s32.totalorder %s668_s15, 2  ;;  %s324_s16 = scalar_lea.sflag [#allocation4], %s323_s9 }
  0x8d   : > { %p465_p9 = pnand %p955_p0, %p954_p2 }
  0x8f   : > { %651 = dma.done.wait (!%p465_p9), %s324_s16, 1024  }
  0x90   : > { %653 = vsyncadd (!%p465_p9), %s324_s16, 4294966272  ;;  %p17_p6 = scmp.ge.s32.totalorder %s723_s18, 4   ;;  %s956_s12 = smov %s660_s13 }
  0x91   : > { %s957_s13 = smov %s664_s14  ;;  %s958_s14 = smov %s735_s21 }
  0x92   : > { %s959_s15 = smov %s723_s18  ;;  %19 = sbr.rel (!%p17_p6) target bundleno = 6 (0x6), region = 85 }
  0x99   :  { %329 = vsyncpa [#allocation3], 1 }
  0x9a   :  { %331 = vsyncpa [#allocation3 + $0x1], 1 }
  0x9b   :  { %332 = vsyncpa [#allocation6], 1 }
  0x9c   :  { %333 = vsyncpa [#allocation4], 1 }
  0x9d   :  { %335 = vsyncpa [#allocation4 + $0x1], 1 }

// kernel: unet_encoder_forward.2
= control target key start
LH: loop header
LB: loop body
LE: loop exit
PB: predicated region body
PF: predicated region fallthrough
CT: control target
= control target key end

     0   :  { %10 = vsyncpa [#allocation3], 0  ;;  %s1411_s0 = inlined_call_operand.hbm [shape: bf16[128,128], index: 0, kind: input, shape index: {}]   ;;  %s1412_s1 = inlined_call_operand.hbm [shape: bf16[128,128], index: 1, kind: input, shape index: {}]   ;;  %s1413_s2 = inlined_call_operand.hbm [shape: bf16[128,128], index: 2, kind: output, shape index: {0}]   ;;  %s1414_s3 = inlined_call_operand.hbm [shape: f32[2,8,128], index: 3, kind: output, shape index: {1}]   ;;  %s1415_s4 = inlined_call_operand.hbm [shape: f32[2,8,128], index: 4, kind: output, shape index: {2}]  }
   0x1   :  { %12 = vsyncpa [#allocation3 + $0x1], 0 }
   0x2   :  { %13 = vsyncpa [#allocation6], 0 }
   0x3   :  { %14 = vsyncpa [#allocation4], 0 }
   0x4   :  { %16 = vsyncpa [#allocation4 + $0x1], 0 }
   0x5   :  { %17 = vsyncpa [#allocation9], 0 }
   0x6   :  { %19 = vsyncpa [#allocation9 + $0x1], 0  ;;  %s1117_s15 = smov 0   ;;  %s1119_s16 = smov 0  }
   0x7   :  { %s1121_s17 = smov 0   ;;  %s1123_s18 = smov 0  }
   0x8 LB: > { %s1138_s19 = sadd.s32 4294967295, %s1081_s18   ;;  %s683_s20 = sadd.s32 4294967294, %s1081_s18   ;;  %s1081_s18 = sphi %s1123_s18, %s1435_s18   ;;  %s1077_s17 = sphi %s1121_s17, %s1434_s17   ;;  %s1073_s16 = sphi %s1119_s16, %s1433_s16   ;;  %s1069_s15 = sphi %s1117_s15, %s1432_s15  }
   0x9   : > { %p45_p0 = scmp.ne.s32.totalorder %s1073_s16, %s1069_s15  ;;  %p1416_p1 = scmp.eq.s32.totalorder %s1138_s19, 0 }
   0xa   : > { %p96_p3 = scmp.eq.s32.totalorder %s683_s20, 1  ;;  %p684_p5 = scmp.ge.s32.totalorder %s1081_s18, 1 }
   0xb   : > { %p1149_p4 = por %p1416_p1, %p45_p0  ;;  %p155_p7 = scmp.lt.s32.totalorder %s1081_s18, 3 }
   0xc   : > { %p1154_p6 = por %p96_p3, %p45_p0  ;;  %s1083_s24 = smov [#allocation5]  }
   0xd   : > { %s1419_s21 = scalar_select %p1149_p4, 1, 0 }
   0xe   : > { %s1420_s22 = scalar_select %p1154_p6, 1, 0 }
   0xf   : > { %p1159_p8 = pnand %p684_p5, %p155_p7  ;;  %s167_s25 = sshll.u32 %s1083_s24, 4  ;;  %s1163_s25 = int_to_ptr.vmem [resolvable:$true] %s167_s25 }
  0x10   : > { %s1175_s27 = sadd.s32 1, %s1081_s18   ;;  %s32_s28 = sadd.s32 1, %s1077_s17 }
  0x11   : > { %s1421_s23 = scalar_select %p1159_p8, 1, 0 }
  0x12   : > { %p822_p9 = pneg %p1159_p8  ;;  %s29_s29 = ssub.s32 %s1081_s18, %s1175_s27 }
  0x13   : > { %s893_s6 = scalar_lea.hbm %s1412_s1, 1024 }
  0x14   : > { %p1170_p11 = pnand %p822_p9, %p1416_p1  ;;  %p894_p12 = scmp.ne.s32.totalorder %s1412_s1, %s893_s6 }
  0x15   : > { %p900_p5 = scmp.lt.u32.totalorder %s893_s6, %s1412_s1 }
  0x16   : > { %p895_p13 = pneg %p1170_p11 }
  0x18   : > { %p896_p0 = pnand %p895_p13, %p894_p12 }
  0x1a   : > { %p897_p3 = pneg %p896_p0 }
  0x1c   : > { %p902_p7 = pnand %p900_p5, %p897_p3 }
  0x1e   : > { %905 = shalt.err (!%p902_p7)
}
  0x1f   : > { %s906_s11 = scalar_lea.vmem %s1163_s25, 1024  ;;  %p914_p2 = scmp.lt.s32.totalorder %s1163_s25, %s1163_s25 }
  0x20   : > { %p907_p9 = scmp.ne.s32.totalorder %s1163_s25, %s906_s11  ;;  %p915_p6 = scmp.lt.s32.totalorder %s906_s11, %s906_s11 }
  0x22   : > { %p909_p10 = pnand %p907_p9, %p895_p13  ;;  %p916_p4 = por %p915_p6, %p914_p2 }
  0x24   : > { %p910_p1 = pneg %p909_p10 }
  0x26   : > { %p917_p8 = pnand %p916_p4, %p910_p1 }
  0x28   : > { %920 = shalt.err (!%p917_p8)
}
  0x29   : > { %s1084_s12 = smov 64   ;;  %s1085_s13 = smov 4  }
  0x2a   : > { %825 = dma.hbm_to_vmem [thread:$0]  (!%p1170_p11), %s1412_s1, 1024, %s1163_s25, [#allocation6], %s1084_s12, %s1084_s12, %s1085_s13  }
  0x2b   : > { %p30_p1 = scmp.eq.s32.totalorder %s29_s29, 0  ;;  %p39_p2 = scmp.ne.s32.totalorder %s1077_s17, %s1073_s16 }
  0x2c   : > { %p40_p4 = scmp.eq.s32.totalorder %s1081_s18, 0  ;;  %p841_p6 = scmp.lt.s32.totalorder %s1081_s18, 2 }
  0x2d   : > { %s1209_s30 = scalar_select %p30_p1, %s1077_s17, %s32_s28  }
  0x2e   : > { %p41_p8 = por %p40_p4, %p39_p2  ;;  %p1423_p10 = scmp.eq.s32.totalorder %s1138_s19, 1 }
  0x2f   : > { %s181_s26 = sand.u32 1, %s1077_s17   ;;  %s725_s6 = sshll.u32 %s1081_s18, 9 }
  0x30   : > { %p1213_p12 = por %p1423_p10, %p39_p2  ;;  %s687_s7 = sshll.u32 %s181_s26, 5 }
  0x31   : > { %s1222_s10 = scalar_lea.hbm %s1411_s0, %s725_s6  ;;  %s185_s25 = scalar_lea.vmem [#allocation2], %s687_s7 }
  0x32   : > { %s192_s28 = sshll.u32 %s185_s25, 4  ;;  %p1224_p11 = pnand %p841_p6, %p41_p8  ;;  %s1228_s28 = int_to_ptr.vmem [resolvable:$true] %s192_s28 }
  0x33   : > { %s1230_s11 = scalar_lea.sflag [#allocation3], %s181_s26  ;;  %s921_s14 = scalar_lea.hbm %s1222_s10, 512 }
  0x34   : > { %p922_p13 = scmp.ne.s32.totalorder %s1222_s10, %s921_s14  ;;  %p923_p0 = pneg %p1224_p11 }
  0x35   : > { %s926_s7 = scalar_lea.hbm %s1411_s0, 1024  ;;  %p927_p7 = scmp.lt.u32.totalorder %s1222_s10, %s1411_s0 }
  0x36   : > { %p924_p3 = pnand %p923_p0, %p922_p13  ;;  %p928_p9 = scmp.lt.u32.totalorder %s926_s7, %s921_s14 }
  0x37   : > { %p930_p2 = scmp.lt.u32.totalorder %s921_s14, %s1222_s10 }
  0x38   : > { %p925_p5 = pneg %p924_p3  ;;  %p929_p1 = por %p928_p9, %p927_p7 }
  0x3a   : > { %p931_p4 = por %p930_p2, %p929_p1 }
  0x3c   : > { %p932_p6 = pnand %p931_p4, %p925_p5 }
  0x3e   : > { %935 = shalt.err (!%p932_p6)
}
  0x3f   : > { %s936_s26 = scalar_lea.vmem %s1228_s28, 512  ;;  %s1086_s25 = smov [#allocation2]  }
  0x40   : > { %p937_p8 = scmp.ne.s32.totalorder %s1228_s28, %s936_s26  ;;  %s941_s24 = sshll.u32 %s1086_s25, 4  ;;  %s942_s24 = int_to_ptr.vmem [resolvable:$false] %s941_s24 }
  0x41   : > { %s943_s6 = scalar_lea.vmem %s942_s24, 1024  ;;  %p944_p3 = scmp.lt.s32.totalorder %s1228_s28, %s942_s24 }
  0x42   : > { %p939_p10 = pnand %p937_p8, %p923_p0  ;;  %p945_p7 = scmp.lt.s32.totalorder %s943_s6, %s936_s26 }
  0x44   : > { %p940_p13 = pneg %p939_p10  ;;  %p946_p9 = por %p945_p7, %p944_p3 }
  0x46   : > { %p947_p1 = pnand %p946_p9, %p940_p13 }
  0x48   : > { %950 = shalt.err (!%p947_p1)
}
  0x49   : > { %829 = dma.hbm_to_vmem [thread:$0]  (!%p1224_p11), %s1222_s10, 512, %s1228_s28, %s1230_s11, %s1084_s12, %s1084_s12, %s1085_s13  }
  0x4a   : > { %p1426_p0 = scmp.ne.s32.totalorder %s1421_s23, 0 }
  0x4b   : > { %s1264_s14 = sand.u32 (!%p1426_p0), 1, %s1073_s16   ;;  %p1427_p5 = scmp.ne.s32.totalorder (!%p1426_p0), %s1419_s21, 0 }
  0x4c   : > { %204 = sbr.rel (%p1426_p0) target bundleno = 408 (0x198), region = 28  ;;  %s691_s7 = sshll.u32 (!%p1426_p0), %s1264_s14, 5 }
  0x4d   : > { %s207_s8 = scalar_lea.sflag (!%p1426_p0), [#allocation3], %s1264_s14  ;;  %s1270_s29 = scalar_lea.vmem (!%p1426_p0), [#allocation2], %s691_s7 }
  0x53   : > { %1052 = dma.done.wait (%p1427_p5), %s207_s8, 512  }
  0x54   : > { %1054 = vsyncadd (%p1427_p5), %s207_s8, 4294966784  ;;  %p1428_p11 = scmp.eq.s32.totalorder %s1138_s19, 0 }
  0x56   : > { %1056 = dma.done.wait (%p1428_p11), [#allocation6], 1024   ;;  %p1429_p2 = pmov %p1428_p11 }
  0x57   : > { %v881_v0 = vld [vmem:[#allocation5] sm:$0xff]   ;;  %v882_v1 = vld [vmem:[#allocation5 + $0x8] sm:$0xff]   ;;  %v883_v2 = vld [vmem:[#allocation5 + $0x10] sm:$0xff]   ;;  %s234_s21 = scalar_lea.vmem [#allocation7], %s691_s7  ;;  %s734_s12 = sshll.u32 %s1138_s19, 9 }
  0x58   : > { %1058 = vsyncadd (%p1429_p2), [#allocation6], 4294966272  ;;  %770 = vmatprep.subr.bf16.mxu0 %v881_v0  ;;  %794 = vmatprep.subr.bf16.mxu1 %v881_v0  ;;  %v884_v3 = vld [vmem:[#allocation5 + $0x18] sm:$0xff]   ;;  %v889_v4 = vld [vmem:[%s1270_s29] sm:$0xff]   ;;  %s513_s23 = sshll.u32 %s234_s21, 4  ;;  %s1295_s28 = scalar_lea.hbm %s1413_s2, %s734_s12  ;;  %s1289_s23 = int_to_ptr.vmem [resolvable:$true] %s513_s23 }
  0x59   : > { %771 = vmatpush3.bf16.msra.mxu0 %v881_v0  ;;  %802 = vmatpush3.bf16.msra.mxu1 %v881_v0  ;;  %v891_v5 = vld [vmem:[%s1270_s29 + $0x10] sm:$0xff]   ;;  %v885_v6 = vld [vmem:[#allocation5 + $0x20] sm:$0xff]   ;;  %v886_v7 = vld [vmem:[#allocation5 + $0x28] sm:$0xff]   ;;  %s490_s11 = scalar_lea.sflag [#allocation4], %s1264_s14  ;;  %s951_s9 = scalar_lea.vmem %s1289_s23, 512 }
  0x5a   : > { %772 = vmatprep.subr.bf16.mxu0 %v882_v1  ;;  %795 = vmatprep.subr.bf16.mxu1 %v882_v1  ;;  %v887_v8 = vld [vmem:[#allocation5 + $0x30] sm:$0xff]   ;;  %v888_v9 = vld [vmem:[#allocation5 + $0x38] sm:$0xff]   ;;  %v890_v10 = vld [vmem:[%s1270_s29 + $0x8] sm:$0xff]   ;;  %p952_p4 = scmp.ne.s32.totalorder %s1289_s23, %s951_s9  ;;  %s1087_s26 = smov [#allocation7]  }
  0x5b   : > { %786 = vmatprep.mubr.bf16.mxu0 %v889_v4  ;;  %790 = vmatprep.mubr.bf16.mxu1 %v891_v5  ;;  %v892_v11 = vld [vmem:[%s1270_s29 + $0x18] sm:$0xff]   ;;  %s955_s25 = sshll.u32 %s1087_s26, 4  ;;  %s956_s25 = int_to_ptr.vmem [resolvable:$false] %s955_s25 }
  0x5c   : > { %p953_p6 = pnand %p952_p4, %p1213_p12  ;;  %s957_s24 = scalar_lea.vmem %s956_s25, 1024 }
  0x5d   : > { %773 = vmatpush3.bf16.msra.mxu0 %v882_v1  ;;  %803 = vmatpush3.bf16.msra.mxu1 %v882_v1  ;;  %p958_p10 = scmp.lt.s32.totalorder %s1289_s23, %s956_s25  ;;  %p959_p13 = scmp.lt.s32.totalorder %s957_s24, %s951_s9 }
  0x5e   : > { %774 = vmatprep.subr.bf16.mxu0 %v883_v2  ;;  %796 = vmatprep.subr.bf16.mxu1 %v883_v2  ;;  %p954_p8 = pneg %p953_p6 }
  0x5f   : > { %p960_p3 = por %p959_p13, %p958_p10 }
  0x61   : > { %775 = vmatpush3.bf16.msra.mxu0 %v883_v2  ;;  %804 = vmatpush3.bf16.msra.mxu1 %v883_v2  ;;  %p961_p7 = pnand %p960_p3, %p954_p8 }
  0x62   : > { %776 = vmatprep.subr.bf16.mxu0 %v884_v3  ;;  %797 = vmatprep.subr.bf16.mxu1 %v884_v3 }
  0x65   : > { %777 = vmatpush3.bf16.msra.mxu0 %v884_v3  ;;  %805 = vmatpush3.bf16.msra.mxu1 %v884_v3 }
  0x66   : > { %778 = vmatprep.subr.bf16.mxu0 %v885_v6  ;;  %798 = vmatprep.subr.bf16.mxu1 %v885_v6 }
  0x69   : > { %779 = vmatpush3.bf16.msra.mxu0 %v885_v6  ;;  %806 = vmatpush3.bf16.msra.mxu1 %v885_v6 }
  0x6a   : > { %780 = vmatprep.subr.bf16.mxu0 %v886_v7  ;;  %799 = vmatprep.subr.bf16.mxu1 %v886_v7 }
  0x6d   : > { %781 = vmatpush3.bf16.msra.mxu0 %v886_v7  ;;  %807 = vmatpush3.bf16.msra.mxu1 %v886_v7 }
  0x6e   : > { %782 = vmatprep.subr.bf16.mxu0 %v887_v8  ;;  %800 = vmatprep.subr.bf16.mxu1 %v887_v8 }
  0x71   : > { %783 = vmatpush3.bf16.msra.mxu0 %v887_v8  ;;  %808 = vmatpush3.bf16.msra.mxu1 %v887_v8 }
  0x72   : > { %784 = vmatprep.subr.bf16.mxu0 %v888_v9  ;;  %801 = vmatprep.subr.bf16.mxu1 %v888_v9 }
  0x75   : > { %785 = vmatpush3.bf16.msra.mxu0 %v888_v9  ;;  %809 = vmatpush3.bf16.msra.mxu1 %v888_v9 }
  0x78   : > { %787 = vmatmul.mubr.bf16.vlgmr.msra.gmra.mrb[0].mxu0 %v890_v10  ;;  %791 = vmatmul.mubr.bf16.vlgmr.msra.gmra.mrb[0].mxu1 %v892_v11 }
 0x14b   : > { %v788_v12 = vpop.f32.mrb[0].mxu0  ;;  %v1286_v13 = vpop.f32.mrb[0].mxu1 }
 0x14c   : > { %v382_v14 = vpop.f32.mrb[1].mxu0  ;;  %v398_v15 = vpop.f32.mrb[1].mxu1  ;;  %v428_v27 = vmul.f32 %v788_v12, %v788_v12 }
 0x14d   : > { %v789_v16 = vpop.f32.mrb[2].mxu0  ;;  %v793_v17 = vpop.f32.mrb[2].mxu1  ;;  %v426_v22 = vmul.f32 %v382_v14, %v382_v14  ;;  %v430_v33 = vmul.f32 %v398_v15, %v398_v15 }
 0x14e   : > { %v743_v18 = vpack.c.bf16 %v789_v16, %v788_v12  ;;  %v385_v19 = vpop.f32.mrb[3].mxu0  ;;  %v753_v20 = vpack.c.bf16 %v793_v17, %v1286_v13  ;;  %v401_v21 = vpop.f32.mrb[3].mxu1  ;;  %v429_v30 = vmul.f32 %v789_v16, %v789_v16 }
 0x14f   : > { %v413_v23 = vadd.f32 %v385_v19, %v382_v14  ;;  %v427_v24 = vmul.f32 %v385_v19, %v385_v19  ;;  %v738_v25 = vpack.c.bf16 %v385_v19, %v382_v14  ;;  %v748_v26 = vpack.c.bf16 %v401_v21, %v398_v15 }
 0x150   : > { %755 = vst [vmem:[%s234_s21 + $0x8] sm:$0xff] %v743_v18   ;;  %757 = vst [vmem:[%s234_s21 + $0x18] sm:$0xff] %v753_v20  }
 0x151   : > { %v414_v28 = vadd.f32 %v788_v12, %v413_v23  ;;  %v434_v29 = vadd.f32 %v427_v24, %v426_v22  ;;  %739 = vst [vmem:[%s234_s21] sm:$0xff] %v738_v25   ;;  %756 = vst [vmem:[%s234_s21 + $0x10] sm:$0xff] %v748_v26  }
 0x153   : > { %v435_v31 = vadd.f32 %v434_v29, %v428_v27  ;;  %v415_v32 = vadd.f32 %v789_v16, %v414_v28 }
 0x154   : > { %964 = shalt.err (!%p961_p7)
}
 0x155   : > { %s965_s6 = scalar_lea.hbm %s1295_s28, 512  ;;  %s969_s29 = scalar_lea.hbm %s1413_s2, 1024 }
 0x156   : > { %p966_p9 = scmp.ne.s32.totalorder %s1295_s28, %s965_s6  ;;  %p970_p5 = scmp.lt.u32.totalorder %s1295_s28, %s1413_s2 }
 0x157   : > { %p971_p11 = scmp.lt.u32.totalorder %s969_s29, %s965_s6  ;;  %p973_p4 = scmp.lt.u32.totalorder %s965_s6, %s1295_s28 }
 0x158   : > { %p967_p1 = pnand %p966_p9, %p1213_p12 }
 0x159   : > { %p972_p2 = por %p971_p11, %p970_p5 }
 0x15a   : > { %p968_p0 = pneg %p967_p1 }
 0x15b   : > { %p974_p6 = por %p973_p4, %p972_p2 }
 0x15d   : > { %p975_p8 = pnand %p974_p6, %p968_p0 }
 0x15f   : > { %978 = shalt.err (!%p975_p8)
}
 0x160   : > { %s1088_s13 = smov 64   ;;  %s1089_s10 = smov 4   ;;  %v416_v34 = vadd.f32 %v415_v32, %v398_v15  ;;  %v436_v35 = vadd.f32 %v435_v31, %v429_v30  ;;  %v431_v38 = vmul.f32 %v401_v21, %v401_v21  ;;  %v432_v39 = vmul.f32 %v1286_v13, %v1286_v13 }
 0x161   : > { %816 = dma.vmem_to_hbm [thread:$0]  (%p1213_p12), %s1289_s23, 512, %s1295_s28, %s490_s11, %s1088_s13, %s1088_s13, %s1089_s10   ;;  %v433_v42 = vmul.f32 %v793_v17, %v793_v17 }
 0x162   : > { %v437_v36 = vadd.f32 %v436_v35, %v430_v33  ;;  %v417_v37 = vadd.f32 %v416_v34, %v401_v21  ;;  %s694_s9 = sshll.u32 %s1264_s14, 3  ;;  %s494_s23 = sand.u32 1, %s1138_s19  }
 0x163   : > { %s721_s28 = sshll.u32 %s1138_s19, 7  ;;  %s241_s11 = scalar_lea.vmem [#allocation8], %s694_s9 }
 0x164   : > { %v418_v40 = vadd.f32 %v1286_v13, %v417_v37  ;;  %v438_v41 = vadd.f32 %v437_v36, %v431_v38  ;;  %s529_s26 = sshll.u32 %s241_s11, 4  ;;  %s1327_s25 = scalar_lea.vmem [#allocation10], %s694_s9  ;;  %s1335_s26 = int_to_ptr.vmem [resolvable:$true] %s529_s26 }
 0x165   : > { %s542_s24 = sshll.u32 %s1327_s25, 4  ;;  %s1333_s7 = scalar_lea.hbm %s1414_s3, %s721_s28  ;;  %s1342_s24 = int_to_ptr.vmem [resolvable:$true] %s542_s24 }
 0x166   : > { %v419_v43 = vadd.f32 %v793_v17, %v418_v40  ;;  %v439_v44 = vadd.f32 %v438_v41, %v432_v39  ;;  %s1340_s29 = scalar_lea.hbm %s1415_s4, %s721_s28  ;;  %s1344_s21 = scalar_lea.sflag [#allocation9], %s494_s23 }
 0x167   : > { %s979_s12 = scalar_lea.vmem %s1335_s26, 128  ;;  %s1090_s13 = smov [#allocation8]  }
 0x168   : > { %v420_v45 = vrot.slane %v419_v43, 4  ;;  %v440_v46 = vadd.f32 %v439_v44, %v433_v42  ;;  %p980_p10 = scmp.ne.s32.totalorder %s1335_s26, %s979_s12  ;;  %s983_s10 = sshll.u32 %s1090_s13, 4  ;;  %s984_s10 = int_to_ptr.vmem [resolvable:$false] %s983_s10 }
 0x169   : > { %s985_s9 = scalar_lea.vmem %s984_s10, 256  ;;  %p986_p7 = scmp.lt.s32.totalorder %s1335_s26, %s984_s10 }
 0x16a   : > { %v421_v47 = vadd.f32 %v420_v45, %v419_v43  ;;  %v441_v48 = vrot.slane %v440_v46, 4  ;;  %p981_p13 = pnand %p980_p10, %p1213_p12  ;;  %p987_p9 = scmp.lt.s32.totalorder %s985_s9, %s979_s12 }
 0x16c   : > { %v422_v49 = vrot.slane %v421_v47, 2  ;;  %v442_v50 = vadd.f32 %v441_v48, %v440_v46  ;;  %p982_p3 = pneg %p981_p13  ;;  %p988_p1 = por %p987_p9, %p986_p7 }
 0x16e   : > { %v423_v51 = vadd.f32 %v422_v49, %v421_v47  ;;  %v443_v52 = vrot.slane %v442_v50, 2  ;;  %p989_p0 = pnand %p988_p1, %p982_p3 }
 0x170   : > { %v424_v53 = vrot.slane %v423_v51, 1  ;;  %v444_v54 = vadd.f32 %v443_v52, %v442_v50 }
 0x172   : > { %v445_v55 = vrot.slane %v444_v54, 1  ;;  %v425_v56 = vadd.f32 %v424_v53, %v423_v51 }
 0x174   : > { %447 = vst [vmem:[%s241_s11] sm:$0xff] %v425_v56  ;;  %v446_v57 = vadd.f32 %v445_v55, %v444_v54 }
 0x175   : > { %992 = shalt.err (!%p989_p0)
}
 0x176   : > { %s993_s23 = scalar_lea.hbm %s1333_s7, 128  ;;  %s997_s14 = scalar_lea.hbm %s1414_s3, 256 }
 0x177   : > { %p994_p5 = scmp.ne.s32.totalorder %s1333_s7, %s993_s23  ;;  %p998_p4 = scmp.lt.u32.totalorder %s1333_s7, %s1414_s3 }
 0x178   : > { %p999_p6 = scmp.lt.u32.totalorder %s997_s14, %s993_s23  ;;  %p1001_p10 = scmp.lt.u32.totalorder %s993_s23, %s1333_s7 }
 0x179   : > { %p995_p11 = pnand %p994_p5, %p1213_p12 }
 0x17a   : > { %p1000_p8 = por %p999_p6, %p998_p4 }
 0x17b   : > { %p996_p2 = pneg %p995_p11 }
 0x17c   : > { %p1002_p13 = por %p1001_p10, %p1000_p8 }
 0x17e   : > { %p1003_p3 = pnand %p1002_p13, %p996_p2 }
 0x180   : > { %1006 = shalt.err (!%p1003_p3)
}
 0x181   : > { %817 = dma.vmem_to_hbm [thread:$0]  (%p1213_p12), %s1335_s26, 128, %s1333_s7, %s1344_s21   ;;  %448 = vst [vmem:[%s1327_s25] sm:$0xff] %v446_v57 }
 0x182   : > { %s1007_s8 = scalar_lea.vmem %s1342_s24, 128  ;;  %s1091_s12 = smov [#allocation10]  }
 0x183   : > { %p1008_p7 = scmp.ne.s32.totalorder %s1342_s24, %s1007_s8  ;;  %s1011_s13 = sshll.u32 %s1091_s12, 4  ;;  %s1012_s13 = int_to_ptr.vmem [resolvable:$false] %s1011_s13 }
 0x184   : > { %s1013_s10 = scalar_lea.vmem %s1012_s13, 256  ;;  %p1014_p0 = scmp.lt.s32.totalorder %s1342_s24, %s1012_s13 }
 0x185   : > { %p1009_p9 = pnand %p1008_p7, %p1213_p12  ;;  %p1015_p5 = scmp.lt.s32.totalorder %s1013_s10, %s1007_s8 }
 0x187   : > { %p1010_p1 = pneg %p1009_p9  ;;  %p1016_p11 = por %p1015_p5, %p1014_p0 }
 0x189   : > { %p1017_p2 = pnand %p1016_p11, %p1010_p1 }
 0x18b   : > { %1020 = shalt.err (!%p1017_p2)
}
 0x18c   : > { %s1021_s26 = scalar_lea.hbm %s1340_s29, 128  ;;  %s1025_s9 = scalar_lea.hbm %s1415_s4, 256 }
 0x18d   : > { %p1022_p4 = scmp.ne.s32.totalorder %s1340_s29, %s1021_s26  ;;  %p1026_p10 = scmp.lt.u32.totalorder %s1340_s29, %s1415_s4 }
 0x18e   : > { %p1027_p13 = scmp.lt.u32.totalorder %s1025_s9, %s1021_s26  ;;  %p1029_p7 = scmp.lt.u32.totalorder %s1021_s26, %s1340_s29 }
 0x18f   : > { %p1023_p6 = pnand %p1022_p4, %p1213_p12 }
 0x190   : > { %p1028_p3 = por %p1027_p13, %p1026_p10 }
 0x191   : > { %p1024_p8 = pneg %p1023_p6 }
 0x192   : > { %p1030_p9 = por %p1029_p7, %p1028_p3 }
 0x194   : > { %p1031_p1 = pnand %p1030_p9, %p1024_p8 }
 0x196   : > { %1034 = shalt.err (!%p1031_p1)
}
 0x197   : > { %818 = dma.vmem_to_hbm [thread:$0]  (%p1213_p12), %s1342_s24, 128, %s1340_s29, %s1344_s21  }
 0x198 PF: > { %s554_s11 = sand.u32 1, %s1069_s15   ;;  %p1430_p0 = scmp.ne.s32.totalorder %s1420_s22, 0 }
 0x199   : > { %p1431_p5 = scmp.ge.s32.totalorder %s1081_s18, 2  ;;  %s555_s14 = scalar_lea.sflag [#allocation4], %s554_s11 }
 0x19b   : > { %p831_p11 = pnand %p1431_p5, %p1430_p0 }
 0x19d   : > { %1060 = dma.done.wait (!%p831_p11), %s555_s14, 512  }
 0x19e   : > { %1062 = vsyncadd (!%p831_p11), %s555_s14, 4294966784  ;;  %s563_s6 = sand.u32 1, %s683_s20  }
 0x19f   : > { %s564_s19 = scalar_lea.sflag [#allocation9], %s563_s6 }
 0x1a0   : > { %1064 = dma.done.wait (!%p831_p11), %s564_s19, 256  }
 0x1a1   : > { %1066 = vsyncadd (!%p831_p11), %s564_s19, 4294967040  ;;  %p22_p12 = scmp.ge.s32.totalorder %s1175_s27, 4   ;;  %s1432_s15 = smov %s1073_s16 }
 0x1a2   : > { %s1433_s16 = smov %s1077_s17  ;;  %s1434_s17 = smov %s1209_s30 }
 0x1a3   : > { %s1435_s18 = smov %s1175_s27  ;;  %24 = sbr.rel (!%p22_p12) target bundleno = 8 (0x8), region = 109 }
 0x1aa   :  { %578 = vsyncpa [#allocation3], 1 }
 0x1ab   :  { %580 = vsyncpa [#allocation3 + $0x1], 1 }
 0x1ac   :  { %581 = vsyncpa [#allocation6], 1 }
 0x1ad   :  { %582 = vsyncpa [#allocation4], 1 }
 0x1ae   :  { %584 = vsyncpa [#allocation4 + $0x1], 1 }
 0x1af   :  { %585 = vsyncpa [#allocation9], 1 }
 0x1b0   :  { %587 = vsyncpa [#allocation9 + $0x1], 1 }

</bundles_post_ra>
